<compile_context>
chip_gen: v7x
topology: tpu7x:2x2x1
jax: 0.10.0
libtpu: 0.0.40
codegen_flags: <defaults>
</compile_context>

<pallas_src>
import jax
import jax.numpy as jnp
from jax.experimental import pallas as pl
from jax.experimental.pallas import tpu as pltpu


def _round_up(n: int, m: int) -> int:
    return ((n + m - 1) // m) * m


def _linear_kernel(x_ref, w_ref, b_ref, o_ref):
    # (tile_b, F) * (1, F) -> VPU elementwise multiply, weight broadcast over
    # sublanes; then an XLU lane reduction gives one value per batch row.
    prod = x_ref[...] * w_ref[...]                      # (tile_b, F)  f32
    row_sums = jnp.sum(prod, axis=-1)                   # (tile_b,)    f32
    # Lane-dense store: batch rows live on the lane axis of the output slab.
    o_ref[...] = (row_sums + b_ref[0])[None, :]         # (1, tile_b)


def simple_neural_net_forward(x, w, b, *, tile_b=None):
    """Forward pass of SimpleNeuralNet (nn.Linear(num_features, 1)).

    x: (batch, num_features) float32
    w: (num_features, 1)     float32  (transposed PyTorch weight)
    b: (1, 1)                float32
    returns: (batch, 1)      float32  ==  x @ w + b
    """
    batch, num_features = x.shape

    if tile_b is None:
        # ~4 MiB per x buffer -> ~8 MiB double-buffered; safely inside the
        # 32 MiB scoped VMEM on every generation (incl. v7x's 64 MiB chip).
        budget_rows = (4 * 1024 * 1024) // (num_features * 4)
        tile_b = max(128, min(2048, (budget_rows // 128) * 128))
    tile_b = max(128, _round_up(tile_b, 128))            # lane-dense tiles
    tile_b = min(tile_b, _round_up(batch, 128))

    batch_p = _round_up(batch, tile_b)
    if batch_p != batch:
        x = jnp.pad(x, ((0, batch_p - batch), (0, 0)))    # zero rows -> sliced off
    num_tiles = batch_p // tile_b

    w_row = w.reshape(1, num_features).astype(jnp.float32)  # features on lanes
    b_s = b.reshape(1).astype(jnp.float32)                  # scalar bias in SMEM

    cost = pl.CostEstimate(
        flops=2 * batch_p * num_features,
        transcendentals=0,
        bytes_accessed=(batch_p * num_features + num_features + 1 + batch_p) * 4,
    )

    out_wide = pl.pallas_call(
        _linear_kernel,
        out_shape=jax.ShapeDtypeStruct((1, batch_p), jnp.float32),
        grid=(num_tiles,),
        in_specs=[
            # x: batch-tiled, features (last dim == full array dim) on lanes.
            pl.BlockSpec((tile_b, num_features), lambda i: (i, 0)),
            # w: same block every step -> stays resident in VMEM.
            pl.BlockSpec((1, num_features), lambda i: (0, 0)),
            # bias: single scalar in SMEM (no VMEM tile padding / extra DMA).
            pl.BlockSpec(memory_space=pltpu.MemorySpace.SMEM),
        ],
        # Lane-dense output slab: each grid step writes a full 128k-lane block.
        out_specs=pl.BlockSpec((1, tile_b), lambda i: (0, i)),
        compiler_params=pltpu.CompilerParams(
            dimension_semantics=("parallel",),        # batch tiles across TCs (v7x)
            vmem_limit_bytes=32 * 1024 * 1024,
        ),
        cost_estimate=cost,
    )(x, w_row, b_s)

    # Back to the PyTorch layout (batch, 1); drop padded rows.
    return out_wide[0, :batch, None]


if __name__ == "__main__":
    # Small deterministic problem; batch deliberately NOT a multiple of 128 so
    # the padding + remainder-slicing path is exercised, and tile_b=128 forces
    # a 2-step grid.
    batch = 200
    num_features = 32

    key = jax.random.PRNGKey(0)
    kx, kw, kb = jax.random.split(key, 3)

    x = jax.random.normal(kx, (batch, num_features), dtype=jnp.float32)
    bound = 1.0 / jnp.sqrt(jnp.float32(num_features))
    w = jax.random.uniform(
        kw, (num_features, 1), dtype=jnp.float32, minval=-bound, maxval=bound
    )
    b = jax.random.uniform(
        kb, (1, 1), dtype=jnp.float32, minval=-bound, maxval=bound
    )

    out = simple_neural_net_forward(x, w, b, tile_b=128)
    out = jax.block_until_ready(out)

    # Reference check against plain JAX (same math as PyTorch's x @ W.T + b).
    ref = x @ w + b
    assert out.shape == (batch, 1)
    assert jnp.allclose(out, ref, atol=1e-5, rtol=1e-5)

    print("KERNEL_OK")
</pallas_src>

<mosaic_0001>
module attributes {stable_mosaic.version = 11 : i64} {
  func.func @_linear_kernel(%arg0: i32, %arg1: memref<128x32xf32, #tpu.memory_space<vmem>>, %arg2: memref<1x32xf32, #tpu.memory_space<vmem>>, %arg3: memref<1xf32, #tpu.memory_space<smem>>, %arg4: memref<1x128xf32, #tpu.memory_space<vmem>>) attributes {dimension_semantics = [#tpu.dimension_semantics<parallel>], iteration_bounds = array<i64: 2>, scalar_prefetch = 0 : i64, scratch_operands = 0 : i64, tpu.core_type = #tpu.core_type<tc>, window_params = [{transform_indices = @transform_0, window_bounds = array<i64: 128, 32>}, {pipeline_mode = #tpu.pipeline_mode<synchronous>, transform_indices = @transform_1, window_bounds = array<i64: 1, 32>}, {transform_indices = @transform_2, window_bounds = array<i64: 1>}, {transform_indices = @transform_3, window_bounds = array<i64: 1, 128>}]} {
    %c0 = arith.constant 0 : index
    %c0_0 = arith.constant 0 : index
    %0 = vector.load %arg1[%c0, %c0_0] : memref<128x32xf32, #tpu.memory_space<vmem>>, vector<128x32xf32>
    %c0_1 = arith.constant 0 : index
    %c0_2 = arith.constant 0 : index
    %1 = vector.load %arg2[%c0_1, %c0_2] : memref<1x32xf32, #tpu.memory_space<vmem>>, vector<1x32xf32>
    %2 = vector.broadcast %1 : vector<1x32xf32> to vector<128x32xf32>
    %3 = arith.mulf %0, %2 : vector<128x32xf32>
    %cst = arith.constant dense<0.000000e+00> : vector<128xf32>
    %4 = vector.multi_reduction <add>, %3, %cst [1] : vector<128x32xf32> to vector<128xf32>
    %c0_3 = arith.constant 0 : index
    %5 = memref.load %arg3[%c0_3] : memref<1xf32, #tpu.memory_space<smem>>
    %6 = vector.broadcast %5 : f32 to vector<128xf32>
    %7 = arith.addf %4, %6 : vector<128xf32>
    %8 = vector.shape_cast %7 : vector<128xf32> to vector<1x128xf32>
    %c0_4 = arith.constant 0 : index
    %c0_5 = arith.constant 0 : index
    %9 = vector.load %arg4[%c0_4, %c0_5] : memref<1x128xf32, #tpu.memory_space<vmem>>, vector<1x128xf32>
    tpu.vector_store %arg4[%c0_4, %c0_5], %8 {strides = array<i32>} : memref<1x128xf32, #tpu.memory_space<vmem>>, vector<1x128xf32>,
    return
  }
  func.func @transform_0(%arg0: i32) -> (i32, i32) {
    %c0_i32 = arith.constant 0 : i32
    %c0_i32_0 = arith.constant 0 : i32
    return %arg0, %c0_i32 : i32, i32
  }
  func.func @transform_1(%arg0: i32) -> (i32, i32) {
    %c0_i32 = arith.constant 0 : i32
    %c0_i32_0 = arith.constant 0 : i32
    %c0_i32_1 = arith.constant 0 : i32
    return %c0_i32, %c0_i32_0 : i32, i32
  }
  func.func @transform_2(%arg0: i32) -> i32 {
    %c0_i32 = arith.constant 0 : i32
    %c0_i32_0 = arith.constant 0 : i32
    return %c0_i32 : i32
  }
  func.func @transform_3(%arg0: i32) -> (i32, i32) {
    %c0_i32 = arith.constant 0 : i32
    %c0_i32_0 = arith.constant 0 : i32
    return %c0_i32, %arg0 : i32, i32
  }
}

</mosaic_0001>

<bundles_post_ra>
// kernel: tpu_custom_call.1
= control target key start
LH: loop header
LB: loop body
LE: loop exit
PB: predicated region body
PF: predicated region fallthrough
CT: control target
= control target key end

     0   :  { %s801_s0 = inlined_call_operand.vmem [shape: f32[256,32], index: 0, kind: input, shape index: {}]   ;;  %s802_s1 = inlined_call_operand.vmem [shape: f32[1,32], index: 1, kind: input, shape index: {}]   ;;  %s803_s2 = inlined_call_operand.<no memory space> [shape: f32[1], index: 2, kind: input, shape index: {}]   ;;  %s804_s3 = inlined_call_operand.hbm [shape: f32[1,256], index: 3, kind: output, shape index: {}]  }
   0x1   :  { %8 = sst [smem:[#allocation2]] %s803_s2 }
   0x2   :  { %9 = vsyncpa [#allocation4], 0 }
   0x3   :  { %11 = vsyncpa [#allocation4 + $0x1], 0  ;;  %s611_s14 = smov 0   ;;  %s613_s15 = smov 0  }
   0x4   :  { %s615_s16 = smov 0   ;;  %s617_s17 = smov 0  }
   0x5 LB: > { %s473_s2 = sadd.s32 4294967295, %s585_s17   ;;  %s474_s18 = sadd.s32 4294967294, %s585_s17   ;;  %s585_s17 = sphi %s617_s17, %s810_s17   ;;  %s581_s16 = sphi %s615_s16, %s809_s16   ;;  %s577_s15 = sphi %s613_s15, %s808_s15   ;;  %s573_s14 = sphi %s611_s14, %s807_s14  }
   0x6   : > { %s634_s19 = sadd.s32 1, %s585_s17   ;;  %s92_s20 = sadd.s32 1, %s581_s16 }
   0x7   : > { %s89_s21 = ssub.s32 %s585_s17, %s634_s19  ;;  %p102_p0 = scmp.ne.s32.totalorder %s581_s16, %s577_s15 }
   0x8   : > { %p90_p1 = scmp.eq.s32.totalorder %s89_s21, 0  ;;  %p103_p2 = scmp.eq.s32.totalorder %s473_s2, 1 }
   0x9   : > { %p108_p3 = scmp.ne.s32.totalorder %s577_s15, %s573_s14  ;;  %p109_p4 = scmp.eq.s32.totalorder %s474_s18, 1 }
   0xa   : > { %s644_s22 = scalar_select %p90_p1, %s581_s16, %s92_s20  }
   0xb   : > { %p646_p5 = por %p103_p2, %p102_p0  ;;  %p650_p6 = por %p109_p4, %p108_p3 }
   0xc   : > { %p477_p7 = scmp.ge.s32.totalorder %s585_s17, 1  ;;  %p142_p8 = scmp.lt.s32.totalorder %s585_s17, 3 }
   0xe   : > { %p143_p9 = pnand %p477_p7, %p142_p8 }
   0xf   : > { %s656_s25 = sshll.u32 (!%p143_p9), %s473_s2, 4  ;;  %v480_v0 = vld [vmem:[%s802_s1] ss:$0 sm:$0xff] (!%p143_p9)  ;;  %vm210_vm0 = vcmask (!%p143_p9), 261120   ;;  %s259_s6 = sld [smem:[#allocation2]] (!%p143_p9)  ;;  %v293_v49 = vlaneseq (!%p143_p9)  ;;  %vm304_vm1 = vcmask (!%p143_p9), 130112  }
  0x10   : > { %146 = sbr.rel (%p143_p9) target bundleno = 221 (0xdd), region = 32  ;;  %p166_p10 = scmp.lt.s32.totalorder (!%p143_p9), %s656_s25, 31  ;;  %vm311_vm2 = vcmask (!%p143_p9), 195712   ;;  %vm318_vm3 = vcmask (!%p143_p9), 261312   ;;  %vm325_vm4 = vcmask (!%p143_p9), 326912   ;;  %vm332_vm5 = vcmask (!%p143_p9), 392512  }
  0x11   : > { %v700_v50 = vand.u32 (!%p143_p9), 127, %v293_v49  ;;  %v702_v51 = vshrl.u32 (!%p143_p9), %v293_v49, 7  ;;  %vm339_vm6 = vcmask (!%p143_p9), 458112   ;;  %vm346_vm7 = vcmask (!%p143_p9), 523712   ;;  %s163_s7 = sand.u32 (!%p143_p9), 1, %s577_s15   ;;  %s759_s12 = scalar_lea.hbm (!%p143_p9), %s804_s3, %s656_s25 }
  0x12   : > { %vm353_vm8 = vcmask (!%p143_p9), 589312   ;;  %vm360_vm9 = vcmask (!%p143_p9), 654912   ;;  %vm367_vm10 = vcmask (!%p143_p9), 720512   ;;  %vm374_vm11 = vcmask (!%p143_p9), 786112   ;;  %s164_s8 = scalar_lea.vmem (!%p143_p9), [#allocation3], %s163_s7  ;;  %s407_s13 = scalar_lea.sflag (!%p143_p9), [#allocation4], %s163_s7 }
  0x13   : > { %v299_v52 = vadd.s32 (!%p143_p9), 4294967288, %v700_v50  ;;  %v313_v53 = vadd.s32 (!%p143_p9), 4294967272, %v700_v50  ;;  %v306_v56 = vadd.s32 (!%p143_p9), 4294967280, %v700_v50  ;;  %v320_v58 = vadd.s32 (!%p143_p9), 4294967264, %v700_v50  ;;  %s419_s9 = sshll.u32 (!%p143_p9), %s164_s8, 4  ;;  %s587_s18 = smov (!%p143_p9), [#allocation3]   ;;  %s761_s9 = int_to_ptr.vmem [resolvable:$true] %s419_s9 }
  0x14   : > { %v297_v59 = vsub.s32 (!%p143_p9), %v700_v50, %v702_v51  ;;  %vm381_vm12 = vcmask (!%p143_p9), 851712   ;;  %vm388_vm13 = vcmask (!%p143_p9), 917312   ;;  %vm395_vm14 = vcmask (!%p143_p9), 982912   ;;  %s523_s2 = scalar_lea.vmem (!%p143_p9), %s761_s9, 16  ;;  %s527_s20 = sshll.u32 (!%p143_p9), %s587_s18, 4  ;;  %s528_s20 = int_to_ptr.vmem [resolvable:$false] %s527_s20 }
  0x15   : > { %v706_v54 = vstv (!%p143_p9), %s259_s6  ;;  %v302_v61 = vsub.s32 (!%p143_p9), %v299_v52, %v702_v51  ;;  %v316_v62 = vsub.s32 (!%p143_p9), %v313_v53, %v702_v51  ;;  %v309_v63 = vsub.s32 (!%p143_p9), %v306_v56, %v702_v51  ;;  %p524_p11 = scmp.ne.s32.totalorder (!%p143_p9), %s761_s9, %s523_s2  ;;  %s529_s21 = scalar_lea.vmem (!%p143_p9), %s528_s20, 32 }
  0x16   : > { %vm402_vm15 = vcmask (!%p143_p9), 1048512   ;;  %p530_p0 = scmp.lt.s32.totalorder (!%p143_p9), %s761_s9, %s528_s20  ;;  %p531_p1 = scmp.lt.s32.totalorder (!%p143_p9), %s529_s21, %s523_s2 }
  0x17   : > { %s167_s26 = scalar_select %p166_p10, %s656_s25, 31 }
  0x18   : > { %p525_p12 = pnand %p524_p11, %p646_p5  ;;  %p532_p2 = por %p531_p1, %p530_p0 }
  0x19   : > { %s479_s27 = sshll.u32 %s167_s26, 3 }
  0x1a   : > { %s666_s5 = scalar_lea.vmem %s801_s0, %s479_s27  ;;  %p526_p13 = pneg %p525_p12 }
  0x1b   : > { %v171_v1 = vld [vmem:[%s666_s5] sm:$0xff]  ;;  %v173_v2 = vld [vmem:[%s666_s5 + $0x10] sm:$0xff]  ;;  %v172_v3 = vld [vmem:[%s666_s5 + $0x8] sm:$0xff] }
  0x1c   : > { %v194_v4 = vmul.f32 %v480_v0, %v171_v1  ;;  %v196_v5 = vmul.f32 %v480_v0, %v173_v2  ;;  %v195_v6 = vmul.f32 %v480_v0, %v172_v3  ;;  %v174_v7 = vld [vmem:[%s666_s5 + $0x18] sm:$0xff]  ;;  %v175_v9 = vld [vmem:[%s666_s5 + $0x20] sm:$0xff]  ;;  %v176_v10 = vld [vmem:[%s666_s5 + $0x28] sm:$0xff]  ;;  %v327_v3 = vadd.s32 4294967256, %v700_v50  ;;  %p533_p3 = pnand %p532_p2, %p526_p13 }
  0x1d   : > { %v197_v8 = vmul.f32 %v480_v0, %v174_v7  ;;  %v198_v15 = vmul.f32 %v480_v0, %v175_v9  ;;  %v199_v16 = vmul.f32 %v480_v0, %v176_v10  ;;  %v177_v17 = vld [vmem:[%s666_s5 + $0x30] sm:$0xff]  ;;  %v178_v18 = vld [vmem:[%s666_s5 + $0x38] sm:$0xff]  ;;  %v179_v23 = vld [vmem:[%s666_s5 + $0x40] sm:$0xff]  ;;  %v334_v10 = vadd.s32 4294967248, %v700_v50 }
  0x1e   : > { %v211_v11 = vsel %vm210_vm0, %v194_v4, 0.0  ;;  %v217_v12 = vsel %vm210_vm0, %v196_v5, 0.0  ;;  %v214_v13 = vsel %vm210_vm0, %v195_v6, 0.0  ;;  %v200_v21 = vmul.f32 %v480_v0, %v177_v17  ;;  %v180_v24 = vld [vmem:[%s666_s5 + $0x48] sm:$0xff]  ;;  %v181_v29 = vld [vmem:[%s666_s5 + $0x50] sm:$0xff]  ;;  %v182_v30 = vld [vmem:[%s666_s5 + $0x58] sm:$0xff] }
  0x1f   : > { %212 = vadd.xlane.f32.xlu0 %v211_v11  ;;  %218 = vadd.xlane.f32.xlu1 %v217_v12  ;;  %v220_v14 = vsel %vm210_vm0, %v197_v8, 0.0  ;;  %v223_v19 = vsel %vm210_vm0, %v198_v15, 0.0  ;;  %v226_v20 = vsel %vm210_vm0, %v199_v16, 0.0  ;;  %v201_v22 = vmul.f32 %v480_v0, %v178_v18  ;;  %v183_v35 = vld [vmem:[%s666_s5 + $0x60] sm:$0xff]  ;;  %v184_v36 = vld [vmem:[%s666_s5 + $0x68] sm:$0xff]  ;;  %v185_v41 = vld [vmem:[%s666_s5 + $0x70] sm:$0xff] }
  0x20   : > { %v229_v25 = vsel %vm210_vm0, %v200_v21, 0.0  ;;  %v202_v27 = vmul.f32 %v480_v0, %v179_v23  ;;  %v203_v28 = vmul.f32 %v480_v0, %v180_v24  ;;  %v204_v33 = vmul.f32 %v480_v0, %v181_v29  ;;  %v186_v42 = vld [vmem:[%s666_s5 + $0x78] sm:$0xff] }
  0x21   : > { %v232_v26 = vsel %vm210_vm0, %v201_v22, 0.0  ;;  %v205_v34 = vmul.f32 %v480_v0, %v182_v30  ;;  %v206_v39 = vmul.f32 %v480_v0, %v183_v35  ;;  %v207_v40 = vmul.f32 %v480_v0, %v184_v36 }
  0x22   : > { %v235_v31 = vsel %vm210_vm0, %v202_v27, 0.0  ;;  %v238_v32 = vsel %vm210_vm0, %v203_v28, 0.0  ;;  %v241_v37 = vsel %vm210_vm0, %v204_v33, 0.0  ;;  %v208_v45 = vmul.f32 %v480_v0, %v185_v41 }
  0x23   : > { %215 = vadd.xlane.f32.xlu0 %v214_v13  ;;  %221 = vadd.xlane.f32.xlu1 %v220_v14  ;;  %v244_v38 = vsel %vm210_vm0, %v205_v34, 0.0  ;;  %v247_v43 = vsel %vm210_vm0, %v206_v39, 0.0  ;;  %v250_v44 = vsel %vm210_vm0, %v207_v40, 0.0  ;;  %v209_v46 = vmul.f32 %v480_v0, %v186_v42 }
  0x24   : > { %v253_v47 = vsel %vm210_vm0, %v208_v45, 0.0  ;;  %v323_v6 = vsub.s32 %v320_v58, %v702_v51  ;;  %v330_v13 = vsub.s32 %v327_v3, %v702_v51  ;;  %v341_v15 = vadd.s32 4294967240, %v700_v50 }
  0x25   : > { %v256_v48 = vsel %vm210_vm0, %v209_v46, 0.0  ;;  %v337_v22 = vsub.s32 %v334_v10, %v702_v51  ;;  %v348_v23 = vadd.s32 4294967232, %v700_v50  ;;  %v355_v28 = vadd.s32 4294967224, %v700_v50 }
  0x26   : > { %v362_v34 = vadd.s32 4294967216, %v700_v50  ;;  %v369_v40 = vadd.s32 4294967208, %v700_v50  ;;  %v376_v46 = vadd.s32 4294967200, %v700_v50 }
  0x27   : > { %224 = vadd.xlane.f32.xlu0 %v223_v19  ;;  %227 = vadd.xlane.f32.xlu1 %v226_v20  ;;  %v351_v33 = vsub.s32 %v348_v23, %v702_v51 }
  0x28   : > { %v365_v45 = vsub.s32 %v362_v34, %v702_v51  ;;  %v372_v52 = vsub.s32 %v369_v40, %v702_v51 }
  0x2b   : > { %230 = vadd.xlane.f32.xlu0 %v229_v25  ;;  %233 = vadd.xlane.f32.xlu1 %v232_v26  ;;  %v344_v26 = vsub.s32 %v341_v15, %v702_v51 }
  0x2f   : > { %236 = vadd.xlane.f32.xlu0 %v235_v31  ;;  %239 = vadd.xlane.f32.xlu1 %v238_v32 }
  0x33   : > { %242 = vadd.xlane.f32.xlu0 %v241_v37  ;;  %245 = vadd.xlane.f32.xlu1 %v244_v38  ;;  %v358_v38 = vsub.s32 %v355_v28, %v702_v51 }
  0x37   : > { %248 = vadd.xlane.f32.xlu0 %v247_v43  ;;  %251 = vadd.xlane.f32.xlu1 %v250_v44 }
  0x3b   : > { %254 = vadd.xlane.f32.xlu0 %v253_v47  ;;  %257 = vadd.xlane.f32.xlu1 %v256_v48 }
  0xac   : > { %v213_v55 = vpop.xlane.xlu0 %212  ;;  %v219_v57 = vpop.xlane.xlu1 %218 }
  0xad   : > { %v261_v60 = vadd.f32 %v706_v54, %v213_v55  ;;  %v263_v0 = vadd.f32 %v706_v54, %v219_v57  ;;  %v383_v55 = vadd.s32 4294967192, %v700_v50 }
  0xaf   : > { %v298_v7 = vrot.slane %v261_v60, %v297_v59  ;;  %v310_v11 = vrot.slane %v263_v0, %v309_v63  ;;  %v379_v60 = vsub.s32 %v376_v46, %v702_v51 }
  0xb0   : > { %v216_v1 = vpop.xlane.xlu0 %215  ;;  %v222_v2 = vpop.xlane.xlu1 %221 }
  0xb1   : > { %v262_v4 = vadd.f32 %v706_v54, %v216_v1  ;;  %v264_v5 = vadd.f32 %v706_v54, %v222_v2  ;;  %v386_v2 = vsub.s32 %v383_v55, %v702_v51 }
  0xb3   : > { %v303_v8 = vrot.slane %v262_v4, %v302_v61  ;;  %v317_v9 = vrot.slane %v264_v5, %v316_v62  ;;  %v390_v61 = vadd.s32 4294967184, %v700_v50  ;;  %v397_v62 = vadd.s32 4294967176, %v700_v50 }
  0xb4   : > { %v225_v12 = vpop.xlane.xlu0 %224  ;;  %v228_v14 = vpop.xlane.xlu1 %227 }
  0xb5   : > { %v305_v16 = vsel %vm304_vm1, %v303_v8, %v298_v7  ;;  %v265_v17 = vadd.f32 %v706_v54, %v225_v12  ;;  %v266_v18 = vadd.f32 %v706_v54, %v228_v14  ;;  %v393_v8 = vsub.s32 %v390_v61, %v702_v51 }
  0xb6   : > { %v312_v19 = vsel %vm311_vm2, %v310_v11, %v305_v16 }
  0xb7   : > { %v319_v20 = vsel %vm318_vm3, %v317_v9, %v312_v19  ;;  %v324_v21 = vrot.slane %v265_v17, %v323_v6  ;;  %v331_v24 = vrot.slane %v266_v18, %v330_v13  ;;  %v400_v9 = vsub.s32 %v397_v62, %v702_v51 }
  0xb8   : > { %v231_v25 = vpop.xlane.xlu0 %230  ;;  %v234_v27 = vpop.xlane.xlu1 %233 }
  0xb9   : > { %v326_v29 = vsel %vm325_vm4, %v324_v21, %v319_v20  ;;  %v267_v30 = vadd.f32 %v706_v54, %v231_v25  ;;  %v268_v31 = vadd.f32 %v706_v54, %v234_v27 }
  0xba   : > { %v333_v35 = vsel %vm332_vm5, %v331_v24, %v326_v29 }
  0xbb   : > { %v338_v32 = vrot.slane %v267_v30, %v337_v22  ;;  %v345_v36 = vrot.slane %v268_v31, %v344_v26 }
  0xbc   : > { %v237_v37 = vpop.xlane.xlu0 %236  ;;  %v240_v39 = vpop.xlane.xlu1 %239 }
  0xbd   : > { %v340_v41 = vsel %vm339_vm6, %v338_v32, %v333_v35  ;;  %v269_v42 = vadd.f32 %v706_v54, %v237_v37  ;;  %v270_v43 = vadd.f32 %v706_v54, %v240_v39 }
  0xbe   : > { %v347_v47 = vsel %vm346_vm7, %v345_v36, %v340_v41 }
  0xbf   : > { %v352_v44 = vrot.slane %v269_v42, %v351_v33  ;;  %v359_v48 = vrot.slane %v270_v43, %v358_v38 }
  0xc0   : > { %v243_v49 = vpop.xlane.xlu0 %242  ;;  %v246_v53 = vpop.xlane.xlu1 %245 }
  0xc1   : > { %v354_v56 = vsel %vm353_vm8, %v352_v44, %v347_v47  ;;  %v271_v57 = vadd.f32 %v706_v54, %v243_v49  ;;  %v272_v58 = vadd.f32 %v706_v54, %v246_v53 }
  0xc2   : > { %v361_v63 = vsel %vm360_vm9, %v359_v48, %v354_v56 }
  0xc3   : > { %v366_v59 = vrot.slane %v271_v57, %v365_v45  ;;  %v373_v0 = vrot.slane %v272_v58, %v372_v52 }
  0xc4   : > { %v249_v1 = vpop.xlane.xlu0 %248  ;;  %v252_v3 = vpop.xlane.xlu1 %251 }
  0xc5   : > { %v368_v4 = vsel %vm367_vm10, %v366_v59, %v361_v63  ;;  %v273_v5 = vadd.f32 %v706_v54, %v249_v1  ;;  %v274_v6 = vadd.f32 %v706_v54, %v252_v3 }
  0xc6   : > { %v375_v50 = vsel %vm374_vm11, %v373_v0, %v368_v4 }
  0xc7   : > { %v380_v7 = vrot.slane %v273_v5, %v379_v60  ;;  %v387_v10 = vrot.slane %v274_v6, %v386_v2 }
  0xc8   : > { %v255_v11 = vpop.xlane.xlu0 %254  ;;  %v258_v12 = vpop.xlane.xlu1 %257 }
  0xc9   : > { %v382_v13 = vsel %vm381_vm12, %v380_v7, %v375_v50  ;;  %v275_v14 = vadd.f32 %v706_v54, %v255_v11  ;;  %v276_v15 = vadd.f32 %v706_v54, %v258_v12 }
  0xca   : > { %v389_v18 = vsel %vm388_vm13, %v387_v10, %v382_v13 }
  0xcb   : > { %v394_v16 = vrot.slane %v275_v14, %v393_v8  ;;  %v401_v17 = vrot.slane %v276_v15, %v400_v9 }
  0xcd   : > { %v396_v51 = vsel %vm395_vm14, %v394_v16, %v389_v18 }
  0xce   : > { %v403_v54 = vsel %vm402_vm15, %v401_v17, %v396_v51 }
  0xcf   : > { %405 = vst [vmem:[%s164_s8] sm:$0x1] %v403_v54 }
  0xd0   : > { %536 = shalt.err (!%p533_p3)
}
  0xd1   : > { %s537_s25 = scalar_lea.hbm %s759_s12, 16  ;;  %s541_s28 = scalar_lea.hbm %s804_s3, 32 }
  0xd2   : > { %p538_p4 = scmp.ne.s32.totalorder %s759_s12, %s537_s25  ;;  %p542_p9 = scmp.lt.u32.totalorder %s759_s12, %s804_s3 }
  0xd3   : > { %p543_p10 = scmp.lt.u32.totalorder %s541_s28, %s537_s25  ;;  %p545_p12 = scmp.lt.u32.totalorder %s537_s25, %s759_s12 }
  0xd4   : > { %p539_p7 = pnand %p538_p4, %p646_p5 }
  0xd5   : > { %p544_p11 = por %p543_p10, %p542_p9 }
  0xd6   : > { %p540_p8 = pneg %p539_p7 }
  0xd7   : > { %p546_p13 = por %p545_p12, %p544_p11 }
  0xd9   : > { %p547_p0 = pnand %p546_p13, %p540_p8 }
  0xdb   : > { %550 = shalt.err (!%p547_p0)
}
  0xdc   : > { %484 = dma.vmem_to_hbm [thread:$0]  (%p646_p5), %s761_s9, 16, %s759_s12, %s407_s13  }
  0xdd PF: > { %p490_p1 = scmp.ge.s32.totalorder %s585_s17, 2  ;;  %s431_s4 = sand.u32 1, %s573_s14  }
  0xde   : > { %s432_s5 = scalar_lea.sflag [#allocation4], %s431_s4 }
  0xdf   : > { %p487_p2 = pnand %p490_p1, %p650_p6 }
  0xe1   : > { %568 = dma.done.wait (!%p487_p2), %s432_s5, 16  }
  0xe2   : > { %570 = vsyncadd (!%p487_p2), %s432_s5, 4294967280  ;;  %p14_p3 = scmp.ge.s32.totalorder %s634_s19, 4   ;;  %s807_s14 = smov %s577_s15 }
  0xe3   : > { %s808_s15 = smov %s581_s16  ;;  %s809_s16 = smov %s644_s22 }
  0xe4   : > { %s810_s17 = smov %s634_s19  ;;  %16 = sbr.rel (!%p14_p3) target bundleno = 5 (0x5), region = 67 }
  0xeb   :  { %436 = vsyncpa [#allocation4], 1 }
  0xec   :  { %438 = vsyncpa [#allocation4 + $0x1], 1 }

</bundles_post_ra>
